<compile_context>
chip_gen: v7x
topology: tpu7x:2x2x1
jax: 0.10.0
libtpu: 0.0.40
codegen_flags: <defaults>
</compile_context>

<pallas_src>
import functools

import jax
import jax.numpy as jnp
from jax.experimental import pallas as pl
from jax.experimental.pallas import tpu as pltpu


def _ls_ce_kernel(logits_ref, target_ref, out_ref, *,
                  base_w: float, tgt_w: float, n_total: int,
                  tile_n: int, tiles_per_core: int):
    core = pl.program_id(0)          # megacore axis (size 1 on single-TC parts)
    j = pl.program_id(1)             # reduction axis: row tiles per core

    # Output block is resident across the reduction axis -> use it as accumulator.
    @pl.when(j == 0)
    def _():
        out_ref[...] = jnp.zeros_like(out_ref)

    x = logits_ref[...]                                   # (tn, C), native dtype
    tn, nc = x.shape

    # Pass 1: row max in native dtype (upcast deferred to consumers).
    m = jnp.max(x, axis=-1, keepdims=True).astype(jnp.float32)         # (tn, 1)

    # Pass 2: exp(x - m) and class-sum; exp exactly once per element (EUP).
    p_sum = jnp.sum(jnp.exp(x.astype(jnp.float32) - m), axis=-1, keepdims=True)
    lse = m + jnp.log(p_sum)                                            # (tn, 1)

    # Pass 3: fused weighted class reduction.
    #   loss_r = lse_r - sum_c w_rc * x_rc,  w_rc = eps/C + (1-eps)*[c == target_r]
    tgt = target_ref[...].astype(jnp.int32)                             # (tn, 1)
    col_ids = jax.lax.broadcasted_iota(jnp.int32, (tn, nc), 1)
    w = jnp.where(col_ids == tgt, jnp.float32(tgt_w), jnp.float32(base_w))
    ws = jnp.sum(w * x.astype(jnp.float32), axis=-1, keepdims=True)     # (tn, 1)

    per_row = lse - ws                                                  # (tn, 1)

    # Mask out padded rows.
    row0 = (core * tiles_per_core + j) * tile_n
    row_ids = row0 + jax.lax.broadcasted_iota(jnp.int32, (tn, 1), 0)
    per_row = jnp.where(row_ids < n_total, per_row, 0.0)

    # One per-tile partial sum; splat-accumulate into the dense (1, 8, 128) block.
    out_ref[...] += jnp.sum(per_row)


def _default_num_cores() -> int:
    """2 only on parts with 2 TensorCores per JAX device (v4/v5p megacore, v7x)."""
    try:
        kind = jax.devices()[0].device_kind.lower()
    except Exception:
        return 1
    return 2 if any(t in kind for t in ("v4", "v5p", "v7")) else 1


def label_smoothing_cross_entropy(logits: jax.Array, target: jax.Array,
                                  eps: float = 0.1,
                                  tile_n: int | None = None,
                                  num_cores: int | None = None,
                                  tile_bytes: int = 4 << 20) -> jax.Array:
    """logits: (N, C) float32/bf16, target: (N,) int. Scalar f32 loss (reduction='mean')."""
    n, c = logits.shape
    in_bytes = jnp.dtype(logits.dtype).itemsize

    if num_cores is None:
        num_cores = _default_num_cores()

    # --- tile sizing: byte-capped (~tile_bytes of logits), rows multiple of 8,
    #     row cap raised to 8192 so small-C shapes keep big tiles. ---
    if tile_n is None:
        tile_n = tile_bytes // max(1, c * in_bytes)
        tile_n = max(8, min(8192, (tile_n // 8) * 8))
    else:
        assert tile_n % 8 == 0, "tile_n must be a multiple of 8 (sublane constraint)"

    rows_per_core = -(-n // num_cores)
    rows_per_core = -(-rows_per_core // 8) * 8              # round up to multiple of 8
    tile_n = min(tile_n, rows_per_core)
    tiles_per_core = -(-rows_per_core // tile_n)
    n_pad = num_cores * tiles_per_core * tile_n

    if n_pad != n:
        logits = jnp.pad(logits, ((0, n_pad - n), (0, 0)))
        target = jnp.pad(target, (0, n_pad - n))
    target2d = target.astype(jnp.int32).reshape(n_pad, 1)

    # --- VMEM budget: double-buffered logits + lane-padded int32 target tiles
    #     + per-pass f32 intermediates + resident output vreg + headroom.
    #     Capped at 48 MiB to stay comfortably inside v7x's 64 MiB/TC. ---
    vmem_need = (2 * tile_n * c * in_bytes            # logits double buffer
                 + 2 * tile_n * 512                   # target (tile_n, 1) lane-padded, x2
                 + 2 * tile_n * c * 4                 # f32 working intermediates
                 + 8 * 128 * 4                        # resident output block
                 + (2 << 20))                         # Mosaic internal scratch headroom
    vmem_limit = int(min(max(vmem_need, 16 << 20), 48 << 20))

    kernel = functools.partial(
        _ls_ce_kernel,
        base_w=eps / c, tgt_w=eps / c + (1.0 - eps),
        n_total=n, tile_n=tile_n, tiles_per_core=tiles_per_core)

    partials = pl.pallas_call(
        kernel,
        out_shape=jax.ShapeDtypeStruct((num_cores, 8, 128), jnp.float32),
        grid_spec=pltpu.PrefetchScalarGridSpec(
            num_scalar_prefetch=0,
            grid=(num_cores, tiles_per_core),
            in_specs=[
                pl.BlockSpec((tile_n, c),
                             lambda core, j: (core * tiles_per_core + j, 0)),
                pl.BlockSpec((tile_n, 1),
                             lambda core, j: (core * tiles_per_core + j, 0)),
            ],
            out_specs=pl.BlockSpec((1, 8, 128), lambda core, j: (core, 0, 0)),
        ),
        compiler_params=pltpu.CompilerParams(
            dimension_semantics=("parallel", "arbitrary"),
            vmem_limit_bytes=vmem_limit,
        ),
    )(logits, target2d)

    # combine per-core partial sums; reduction='mean' over the original N rows
    return jnp.sum(partials[:, 0, 0]) / jnp.float32(n)


def _reference(logits, target, eps=0.1):
    # pure-JAX reference mirroring the PyTorch module (reduction='mean')
    c = logits.shape[-1]
    log_preds = jax.nn.log_softmax(logits.astype(jnp.float32), axis=-1)
    loss = jnp.mean(-jnp.sum(log_preds, axis=-1))
    nll = jnp.mean(-jnp.take_along_axis(log_preds, target[:, None], axis=-1)[:, 0])
    return loss * eps / c + (1.0 - eps) * nll


if __name__ == "__main__":
    key = jax.random.PRNGKey(0)
    k1, k2 = jax.random.split(key)

    N, C = 16, 32  # batch, num_classes (small demo shapes)
    logits = jax.random.normal(k1, (N, C), dtype=jnp.float32)
    target = jax.random.randint(k2, (N,), 0, C, dtype=jnp.int32)

    out = label_smoothing_cross_entropy(logits, target, eps=0.1)
    out = jax.block_until_ready(out)

    ref = _reference(logits, target, eps=0.1)
    assert jnp.allclose(out, ref, rtol=1e-5, atol=1e-5), (out, ref)

    print("KERNEL_OK")
</pallas_src>

<mosaic_0001>
module attributes {stable_mosaic.version = 11 : i64} {
  func.func @_ls_ce_kernel(%arg0: i32, %arg1: i32, %arg2: memref<16x32xf32, #tpu.memory_space<vmem>>, %arg3: memref<16x1xi32, #tpu.memory_space<vmem>>, %arg4: memref<1x8x128xf32, #tpu.memory_space<vmem>>) attributes {dimension_semantics = [#tpu.dimension_semantics<parallel>, #tpu.dimension_semantics<arbitrary>], iteration_bounds = array<i64: 1, 1>, scalar_prefetch = 0 : i64, scratch_operands = 0 : i64, tpu.core_type = #tpu.core_type<tc>, window_params = [{transform_indices = @transform_0, window_bounds = array<i64: 16, 32>}, {transform_indices = @transform_1, window_bounds = array<i64: 16, 1>}, {transform_indices = @transform_2, window_bounds = array<i64: 1, 8, 128>}]} {
    %c0_i32 = arith.constant 0 : i32
    %0 = arith.cmpi eq, %arg1, %c0_i32 : i32
    %1 = arith.extui %0 : i1 to i32
    %c0_i32_0 = arith.constant 0 : i32
    %2 = arith.cmpi ne, %1, %c0_i32_0 : i32
    scf.if %2 {
      %cst_17 = arith.constant 0.000000e+00 : f32
      %42 = vector.broadcast %cst_17 : f32 to vector<1x8x128xf32>
      %c0_18 = arith.constant 0 : index
      %c0_19 = arith.constant 0 : index
      %c0_20 = arith.constant 0 : index
      %43 = vector.load %arg4[%c0_18, %c0_19, %c0_20] : memref<1x8x128xf32, #tpu.memory_space<vmem>>, vector<1x8x128xf32>
      tpu.vector_store %arg4[%c0_18, %c0_19, %c0_20], %42 {strides = array<i32>} : memref<1x8x128xf32, #tpu.memory_space<vmem>>, vector<1x8x128xf32>,
    } else {
    }
    %c0 = arith.constant 0 : index
    %c0_1 = arith.constant 0 : index
    %3 = vector.load %arg2[%c0, %c0_1] : memref<16x32xf32, #tpu.memory_space<vmem>>, vector<16x32xf32>
    %cst = arith.constant dense<0xFF800000> : vector<16xf32>
    %4 = vector.multi_reduction <maximumf>, %3, %cst [1] : vector<16x32xf32> to vector<16xf32>
    %5 = vector.shape_cast %4 : vector<16xf32> to vector<16x1xf32>
    %6 = vector.broadcast %5 : vector<16x1xf32> to vector<16x32xf32>
    %7 = arith.subf %3, %6 : vector<16x32xf32>
    %8 = math.exp %7 : vector<16x32xf32>
    %cst_2 = arith.constant dense<0.000000e+00> : vector<16xf32>
    %9 = vector.multi_reduction <add>, %8, %cst_2 [1] : vector<16x32xf32> to vector<16xf32>
    %10 = vector.shape_cast %9 : vector<16xf32> to vector<16x1xf32>
    %11 = math.log %10 : vector<16x1xf32>
    %12 = arith.addf %5, %11 : vector<16x1xf32>
    %c0_3 = arith.constant 0 : index
    %c0_4 = arith.constant 0 : index
    %13 = vector.load %arg3[%c0_3, %c0_4] : memref<16x1xi32, #tpu.memory_space<vmem>>, vector<16x1xi32>
    %14 = tpu.iota {dimensions = array<i32: 1>} : vector<16x32xi32>
    %15 = vector.broadcast %13 : vector<16x1xi32> to vector<16x32xi32>
    %16 = arith.cmpi eq, %14, %15 : vector<16x32xi32>
    %cst_5 = arith.constant 0.903124988 : f32
    %cst_6 = arith.constant 3.125000e-03 : f32
    %17 = vector.broadcast %cst_5 : f32 to vector<16x32xf32>
    %18 = vector.broadcast %cst_6 : f32 to vector<16x32xf32>
    %19 = arith.select %16, %17, %18 : vector<16x32xi1>, vector<16x32xf32>
    %20 = arith.mulf %19, %3 : vector<16x32xf32>
    %cst_7 = arith.constant dense<0.000000e+00> : vector<16xf32>
    %21 = vector.multi_reduction <add>, %20, %cst_7 [1] : vector<16x32xf32> to vector<16xf32>
    %22 = vector.shape_cast %21 : vector<16xf32> to vector<16x1xf32>
    %23 = arith.subf %12, %22 : vector<16x1xf32>
    %c1_i32 = arith.constant 1 : i32
    %24 = arith.muli %arg0, %c1_i32 : i32
    %25 = arith.addi %24, %arg1 : i32
    %c16_i32 = arith.constant 16 : i32
    %26 = arith.muli %25, %c16_i32 : i32
    %27 = tpu.iota {dimensions = array<i32: 0>} : vector<16x1xi32>
    %28 = vector.broadcast %26 : i32 to vector<16x1xi32>
    %29 = arith.addi %28, %27 : vector<16x1xi32>
    %c16_i32_8 = arith.constant 16 : i32
    %30 = vector.broadcast %c16_i32_8 : i32 to vector<16x1xi32>
    %31 = arith.cmpi slt, %29, %30 : vector<16x1xi32>
    %cst_9 = arith.constant 0.000000e+00 : f32
    %32 = vector.broadcast %cst_9 : f32 to vector<16x1xf32>
    %33 = arith.select %31, %23, %32 : vector<16x1xi1>, vector<16x1xf32>
    %c0_10 = arith.constant 0 : index
    %c0_11 = arith.constant 0 : index
    %c0_12 = arith.constant 0 : index
    %34 = vector.load %arg4[%c0_10, %c0_11, %c0_12] : memref<1x8x128xf32, #tpu.memory_space<vmem>>, vector<1x8x128xf32>
    %35 = vector.shape_cast %33 : vector<16x1xf32> to vector<1x16x1xf32>
    %cst_13 = arith.constant dense<0.000000e+00> : vector<1xf32>
    %36 = vector.multi_reduction <add>, %35, %cst_13 [1, 2] : vector<1x16x1xf32> to vector<1xf32>
    %37 = vector.shape_cast %36 : vector<1xf32> to vector<1x1x1xf32>
    %38 = vector.extract %37[0, 0, 0] : f32 from vector<1x1x1xf32>
    %39 = vector.broadcast %38 : f32 to vector<1x8x128xf32>
    %40 = arith.addf %34, %39 : vector<1x8x128xf32>
    %c0_14 = arith.constant 0 : index
    %c0_15 = arith.constant 0 : index
    %c0_16 = arith.constant 0 : index
    %41 = vector.load %arg4[%c0_14, %c0_15, %c0_16] : memref<1x8x128xf32, #tpu.memory_space<vmem>>, vector<1x8x128xf32>
    tpu.vector_store %arg4[%c0_14, %c0_15, %c0_16], %40 {strides = array<i32>} : memref<1x8x128xf32, #tpu.memory_space<vmem>>, vector<1x8x128xf32>,
    return
  }
  func.func @transform_0(%arg0: i32, %arg1: i32) -> (i32, i32) {
    %c1_i32 = arith.constant 1 : i32
    %0 = arith.muli %arg0, %c1_i32 : i32
    %1 = arith.addi %0, %arg1 : i32
    %c0_i32 = arith.constant 0 : i32
    %c0_i32_0 = arith.constant 0 : i32
    return %1, %c0_i32 : i32, i32
  }
  func.func @transform_1(%arg0: i32, %arg1: i32) -> (i32, i32) {
    %c1_i32 = arith.constant 1 : i32
    %0 = arith.muli %arg0, %c1_i32 : i32
    %1 = arith.addi %0, %arg1 : i32
    %c0_i32 = arith.constant 0 : i32
    %c0_i32_0 = arith.constant 0 : i32
    return %1, %c0_i32 : i32, i32
  }
  func.func @transform_2(%arg0: i32, %arg1: i32) -> (i32, i32, i32) {
    %c0_i32 = arith.constant 0 : i32
    %c0_i32_0 = arith.constant 0 : i32
    %c0_i32_1 = arith.constant 0 : i32
    return %arg0, %c0_i32, %c0_i32_0 : i32, i32, i32
  }
}

</mosaic_0001>

<bundles_post_ra>
// kernel: tpu_custom_call.1
= control target key start
LH: loop header
LB: loop body
LE: loop exit
PB: predicated region body
PF: predicated region fallthrough
CT: control target
= control target key end

     0   :  { %vm63_vm0 = vcmask 261120   ;;  %v207_v4 = vmov 0   ;;  %s255_s0 = inlined_call_operand.vmem [shape: f32[16,32], index: 0, kind: input, shape index: {}]   ;;  %s256_s1 = inlined_call_operand.vmem [shape: s32[16,1], index: 1, kind: input, shape index: {}]   ;;  %s257_s2 = inlined_call_operand.hbm [shape: f32[1,8,128], index: 2, kind: output, shape index: {}]  }
   0x1   :  { %v61_v0 = vld [vmem:[%s255_s0] sm:$0xff]  ;;  %v62_v1 = vld [vmem:[%s255_s0 + $0x8] sm:$0xff]  ;;  %173 = vset.pattern.permute.xlu1 %v207_v4  ;;  %174 = vset.pattern.permute.xlu0 %v207_v4 }
   0x2   :  { %v88_v2 = vld [vmem:[%s256_s1] sm:$0xff]  ;;  %v64_v3 = vsel %vm63_vm0, %v61_v0, -inf }
   0x3   :  { %7 = vsyncpa [#allocation3], 0  ;;  %65 = vmax.xlane.f32.xlu0 %v64_v3  ;;  %93 = vperm.xlu1 %173, %v88_v2   ;;  %v67_v5 = vsel %vm63_vm0, %v62_v1, -inf  ;;  %v89_v6 = vld [vmem:[%s256_s1 + $0x8] sm:$0xff]  ;;  %v90_v8 = vlaneseq  ;;  %v208_v17 = vmov 0.003125  }
   0x4   :  { %vm125_vm3 = vcmask 7168   ;;  %s209_s0 = smov [#allocation2]  }
   0x5   :  { %v91_v13 = vand.u32 127, %v90_v8  ;;  %s147_s1 = sshll.u32 %s209_s0, 4  ;;  %s148_s1 = int_to_ptr.vmem [resolvable:$true] %s147_s1 }
   0x6   :  { %s183_s18 = scalar_lea.vmem %s148_s1, 128  ;;  %p188_p1 = scmp.lt.s32.totalorder %s148_s1, %s148_s1 }
   0x7   :  { %68 = vmax.xlane.f32.xlu0 %v67_v5  ;;  %96 = vperm.xlu1 %173, %v89_v6   ;;  %p184_p0 = scmp.ne.s32.totalorder %s148_s1, %s183_s18  ;;  %p189_p2 = scmp.lt.s32.totalorder %s183_s18, %s183_s18 }
   0x9   :  { %p190_p3 = por %p189_p2, %p188_p1 }
   0xb   :  { %p191_p4 = pnand %p190_p3, %p184_p0 }
  0x82   :  { %v94_v11 = vpop.permute.xlu1 %93 }
  0x83   :  { %vm98_vm1 = vcmp.eq.s32.totalorder %v91_v13, %v94_v11 }
  0x84   :  { %v100_v18 = vsel %vm98_vm1, 0.903125, %v208_v17 }
  0x85   :  { %v102_v19 = vmul.f32 %v100_v18, %v61_v0 }
  0x86   :  { %v97_v16 = vpop.permute.xlu1 %96 }
  0x87   :  { %vm99_vm2 = vcmp.eq.s32.totalorder %v91_v13, %v97_v16  ;;  %v104_v23 = vsel %vm63_vm0, %v102_v19, 0.0 }
  0x88   :  { %v101_v21 = vsel %vm99_vm2, 0.903125, %v208_v17 }
  0x89   :  { %v103_v24 = vmul.f32 %v101_v21, %v62_v1 }
  0x8b   :  { %v107_v27 = vsel %vm63_vm0, %v103_v24, 0.0 }
  0x90   :  { %v66_v7 = vpop.xlane.xlu0 %65 }
  0x91   :  { %v70_v9 = vsub.f32 %v61_v0, %v66_v7 }
  0x93   :  { %v72_v10 = vmul.f32 1.442695, %v70_v9 }
  0x94   :  { %v69_v12 = vpop.xlane.xlu0 %68 }
  0x95   :  { %175 = vpow2.f32 %v72_v10  ;;  %v71_v14 = vsub.f32 %v62_v1, %v69_v12 }
  0x97   :  { %v74_v15 = vmul.f32 1.442695, %v71_v14 }
  0x99   :  { %177 = vpow2.f32 %v74_v15 }
  0x9f   :  { %v176_v20 = vpop.eup %175 }
  0xa0   :  { %v76_v22 = vsel %vm63_vm0, %v176_v20, 0.0 }
  0xa1   :  { %77 = vadd.xlane.f32.xlu0 %v76_v22 }
  0xa3   :  { %v178_v25 = vpop.eup %177 }
  0xa4   :  { %v79_v26 = vsel %vm63_vm0, %v178_v25, 0.0 }
  0xa5   :  { %80 = vadd.xlane.f32.xlu1 %v79_v26  ;;  %105 = vadd.xlane.f32.xlu0 %v104_v23 }
  0xa9   :  { %108 = vadd.xlane.f32.xlu0 %v107_v27 }
 0x12e   :  { %v78_v28 = vpop.xlane.xlu0 %77 }
 0x12f   :  { %179 = vlog2.f32 %v78_v28 }
 0x132   :  { %v81_v29 = vpop.xlane.xlu1 %80  ;;  %v106_v32 = vpop.xlane.xlu0 %105 }
 0x133   :  { %181 = vlog2.f32 %v81_v29 }
 0x136   :  { %v109_v38 = vpop.xlane.xlu0 %108 }
 0x139   :  { %v180_v30 = vpop.eup %179 }
 0x13a   :  { %v83_v31 = vmul.f32 0.6931472, %v180_v30 }
 0x13c   :  { %v86_v33 = vadd.f32 %v83_v31, %v66_v7 }
 0x13d   :  { %v182_v34 = vpop.eup %181 }
 0x13e   :  { %v85_v35 = vmul.f32 0.6931472, %v182_v34  ;;  %v110_v36 = vsub.f32 %v86_v33, %v106_v32 }
 0x140   :  { %v87_v37 = vadd.f32 %v85_v35, %v69_v12  ;;  %v126_v40 = vsel %vm125_vm3, %v110_v36, 0.0 }
 0x142   :  { %v111_v39 = vsub.f32 %v87_v37, %v109_v38 }
 0x144   :  { %v127_v41 = vsel %vm125_vm3, %v111_v39, 0.0 }
 0x145   :  { %v128_v42 = vadd.f32 %v127_v41, %v126_v40 }
 0x147   :  { %129 = vadd.xlane.f32.xlu0 %v128_v42 }
 0x1d4   :  { %v130_v43 = vpop.xlane.xlu0 %129 }
 0x1d5   :  { %v131_v44 = vrot.slane %v130_v43, 4 }
 0x1d7   :  { %v132_v45 = vadd.f32 %v131_v44, %v130_v43 }
 0x1d9   :  { %v133_v46 = vrot.slane %v132_v45, 2 }
 0x1db   :  { %v134_v47 = vadd.f32 %v133_v46, %v132_v45 }
 0x1dd   :  { %v135_v48 = vrot.slane %v134_v47, 1 }
 0x1df   :  { %v136_v49 = vadd.f32 %v135_v48, %v134_v47 }
 0x1e1   :  { %167 = vpush %v136_v49 }
 0x212   :  { %s168_s17 = spop %167 }
 0x213   :  { %v138_v50 = vstv %s168_s17 }
 0x214   :  { %140 = vst [vmem:[#allocation2] sm:$0xff] %v138_v50 }
 0x215   :  { %194 = shalt.err (!%p191_p4)
}
 0x216   :  { %s195_s21 = scalar_lea.hbm %s257_s2, 128 }
 0x217   :  { %p196_p5 = scmp.ne.s32.totalorder %s257_s2, %s195_s21  ;;  %p199_p6 = scmp.lt.u32.totalorder %s195_s21, %s257_s2 }
 0x219   :  { %p201_p7 = pnand %p199_p6, %p196_p5 }
 0x21b   :  { %204 = shalt.err (!%p201_p7)
}
 0x21c   :  { %150 = dma.vmem_to_hbm [thread:$0]  %s148_s1, 128, %s257_s2, [#allocation3]  }
 0x21d   :  { %205 = dma.done.wait [#allocation3], 128  }
 0x21e   :  { %206 = vsyncadd [#allocation3], 4294967168 }
 0x21f   :  { %154 = vsyncpa [#allocation3], 1 }

</bundles_post_ra>
